<compile_context>
chip_gen: v5e
topology: v5e:2x2
jax: 0.10.0
libtpu: 0.0.40
codegen_flags: <defaults>
</compile_context>

<pallas_src>
import functools

import jax
import jax.numpy as jnp
from jax import lax
from jax.experimental import pallas as pl
from jax.experimental.pallas import tpu as pltpu


def _round_up(n, m):
    return ((n + m - 1) // m) * m


def _pad_and_reorder_gates(w_t, h, hp):
    """w_t: (K, 4H), PyTorch gate order [i|f|g|o].

    Returns (K, 4*hp) with gate order [i|f|o|g] (sigmoid gates contiguous),
    each gate block zero-padded to hp lanes.
    """
    order = (0, 1, 3, 2)            # i, f, o, g
    blocks = [jnp.pad(w_t[:, k * h:(k + 1) * h], ((0, 0), (0, hp - h)))
              for k in order]
    return jnp.concatenate(blocks, axis=1)


def _lstm_encoder_kernel(maxlen_ref, x_ref, len_ref, wih_ref, whh_ref, bias_ref,
                         w1_ref, b1_ref, y_ref, xproj_scr, h_scr, c_scr, *,
                         hidden_pad, t_chunk, batch_block):
    """One (batch block, time chunk) grid cell of the LSTM encoder.

    maxlen_ref: (n_blocks,) int32 SMEM   per-block max valid length (prefetch)
    x_ref     : (TC, Bb, D_in)           time-major input chunk (mxu dtype)
    len_ref   : (Bb, 1) int32            valid lengths
    wih_ref   : (D_in, 4*HP)             W_ih^T, gates [i|f|o|g] zero-padded
    whh_ref   : (HP, 4*HP)               W_hh^T, gates + extra rows zero-padded
    bias_ref  : (1, 4*HP) f32            b_ih + b_hh, zero-padded
    w1_ref    : (HP, OUT_P)              linear_1 weight^T, zero-padded
    b1_ref    : (1, OUT_P) f32           linear_1 bias, zero-padded
    y_ref     : (Bb, OUT_P) f32          output block (written on last chunk)
    xproj_scr : (TC, Bb, 4*HP) f32       hoisted input projection (per chunk)
    h_scr/c_scr: (Bb, HP) f32            recurrent state, persists across chunks
    """
    HP, TC, Bb = hidden_pad, t_chunk, batch_block
    d_in = x_ref.shape[-1]
    b = pl.program_id(0)
    c = pl.program_id(1)

    @pl.when(c == 0)
    def _():
        h_scr[...] = jnp.zeros_like(h_scr)
        c_scr[...] = jnp.zeros_like(c_scr)

    t0 = c * TC
    # Residual valid steps of this block inside this chunk (ragged early-exit).
    steps = jnp.minimum(maxlen_ref[b] - t0, TC)

    @pl.when(steps > 0)
    def _():
        # (1) Hoisted input projection for this chunk: one MXU matmul over all
        #     chunk timesteps, bias folded in (broadcast once, off the serial path).
        x_flat = x_ref[...].reshape(TC * Bb, d_in)
        proj = (jnp.dot(x_flat, wih_ref[...],
                        preferred_element_type=jnp.float32)
                + bias_ref[...])                               # (TC*Bb, 4*HP) f32
        xproj_scr[...] = proj.reshape(TC, Bb, 4 * HP)

        lengths = len_ref[...]                                 # (Bb, 1) int32

        # (2) Serial recurrence: h/c live in vregs (loop carries); only the
        #     recurrent matmul + gate elementwise math per step.  Dynamic trip
        #     count (block-local residual length) — skips padded timesteps.
        #     TODO(synk): static-TC unrolled variant (lax.fori_loop unroll=4/8)
        #     for latency-critical small-batch configs.
        def step(i, carry):
            h_prev, c_prev = carry
            gates = (xproj_scr[i]                              # (Bb, 4*HP) f32
                     + jnp.dot(h_prev.astype(whh_ref.dtype), whh_ref[...],
                               preferred_element_type=jnp.float32))

            # Gate order [i|f|o|g]: the 3 sigmoid gates are one contiguous slice.
            sig = jax.nn.sigmoid(gates[:, :3 * HP])
            i_g = sig[:, 0 * HP:1 * HP]
            f_g = sig[:, 1 * HP:2 * HP]
            o_g = sig[:, 2 * HP:3 * HP]
            g_g = jnp.tanh(gates[:, 3 * HP:4 * HP])

            c_new = f_g * c_prev + i_g * g_g
            h_new = o_g * jnp.tanh(c_new)

            # pack_padded_sequence semantics: freeze state once t >= length.
            valid = lengths > (t0 + i)
            return (jnp.where(valid, h_new, h_prev),
                    jnp.where(valid, c_new, c_prev))

        h_fin, c_fin = lax.fori_loop(0, steps, step, (h_scr[...], c_scr[...]))
        h_scr[...] = h_fin
        c_scr[...] = c_fin

    # (3) Dropout = identity (inference) + final linear, on the last chunk only.
    # TODO(synk): training-mode dropout would use pltpu.prng_seed + stateful_bernoulli.
    @pl.when(c == pl.num_programs(1) - 1)
    def _():
        y_ref[...] = (jnp.dot(h_scr[...].astype(w1_ref.dtype), w1_ref[...],
                              preferred_element_type=jnp.float32)
                      + b1_ref[...]).astype(y_ref.dtype)


def rnn_encoder_forward(x, lengths, params, *, batch_block=64, time_chunk=16,
                        mxu_dtype=jnp.float32):
    """x: (B, T, in_size) f32, lengths: (B,) int32 -> (B, out_size) f32.

    batch_block: primary tuning knob (MXU rows of the recurrent matmul).
    time_chunk : bounds VMEM residency per generation (x block + xproj scratch).
    mxu_dtype  : jnp.float32 or jnp.bfloat16 (matmul operands only; accumulation
                 and all gate/state elementwise math stay f32).
    """
    assert batch_block % 8 == 0, "batch_block must be a multiple of 8 (sublane)"
    assert time_chunk >= 1

    B, T, d_in = x.shape
    H = params["w_hh"].shape[1]
    out_size = params["w1"].shape[0]

    HP = _round_up(H, 128)            # per-gate width, lane aligned
    OUT_P = _round_up(out_size, 128)  # lane-dense output

    # ---- batch blocking: largest block that fits the batch, but >=2 blocks when
    #      possible so the "parallel" axis can be sharded over v7x's 2 TCs ----
    B_pad8 = _round_up(B, 8)
    B_BLK = min(batch_block, B_pad8)
    if B_pad8 // B_BLK < 2 and B_BLK > 8:
        B_BLK = max(8, _round_up(B_pad8 // 2, 8))
    B_pad = _round_up(B, B_BLK)
    n_blk = B_pad // B_BLK

    # ---- time chunking ----
    TC = min(time_chunk, T)
    T_pad = _round_up(T, TC)
    n_chunk = T_pad // TC

    # ---- operand layout: all padding / transposes / casts done once, host-side ----
    # Contiguous per-block slabs: (n_blk, T_pad, B_BLK, d_in).
    x_p = jnp.pad(x, ((0, B_pad - B), (0, T_pad - T), (0, 0)))
    x_blk = x_p.reshape(n_blk, B_BLK, T_pad, d_in).transpose(0, 2, 1, 3)
    x_blk = x_blk.astype(mxu_dtype)

    len_p = jnp.pad(lengths.astype(jnp.int32), (0, B_pad - B))
    len2d = len_p.reshape(B_pad, 1)
    blk_maxlen = jnp.max(len_p.reshape(n_blk, B_BLK), axis=1).astype(jnp.int32)

    wih_p = _pad_and_reorder_gates(params["w_ih"].T, H, HP).astype(mxu_dtype)    # (D_in, 4*HP)
    whh_p = _pad_and_reorder_gates(params["w_hh"].T, H, HP)                      # (H, 4*HP)
    whh_p = jnp.pad(whh_p, ((0, HP - H), (0, 0))).astype(mxu_dtype)              # (HP, 4*HP)
    bias_p = _pad_and_reorder_gates(
        (params["b_ih"] + params["b_hh"]).reshape(1, 4 * H), H, HP)              # (1, 4*HP) f32
    w1_p = jnp.pad(params["w1"].T,
                   ((0, HP - H), (0, OUT_P - out_size))).astype(mxu_dtype)       # (HP, OUT_P)
    b1_p = jnp.pad(params["b1"].reshape(1, out_size),
                   ((0, 0), (0, OUT_P - out_size)))                              # (1, OUT_P) f32

    kernel = functools.partial(_lstm_encoder_kernel, hidden_pad=HP,
                               t_chunk=TC, batch_block=B_BLK)

    y_pad = pl.pallas_call(
        kernel,
        out_shape=jax.ShapeDtypeStruct((B_pad, OUT_P), jnp.float32),
        grid_spec=pltpu.PrefetchScalarGridSpec(
            num_scalar_prefetch=1,                    # blk_maxlen -> SMEM
            grid=(n_blk, n_chunk),
            in_specs=[
                # x: contiguous per-block slab, chunked along time
                pl.BlockSpec((None, TC, B_BLK, d_in), lambda b, c, ml: (b, c, 0, 0)),
                pl.BlockSpec((B_BLK, 1), lambda b, c, ml: (b, 0)),        # lengths
                pl.BlockSpec((d_in, 4 * HP), lambda b, c, ml: (0, 0)),    # W_ih^T
                pl.BlockSpec((HP, 4 * HP), lambda b, c, ml: (0, 0)),      # W_hh^T
                pl.BlockSpec((1, 4 * HP), lambda b, c, ml: (0, 0)),       # b_ih+b_hh
                pl.BlockSpec((HP, OUT_P), lambda b, c, ml: (0, 0)),       # W1^T
                pl.BlockSpec((1, OUT_P), lambda b, c, ml: (0, 0)),        # b1
            ],
            out_specs=pl.BlockSpec((B_BLK, OUT_P), lambda b, c, ml: (b, 0)),
            scratch_shapes=[
                pltpu.VMEM((TC, B_BLK, 4 * HP), jnp.float32),   # xproj (per chunk)
                pltpu.VMEM((B_BLK, HP), jnp.float32),           # h state
                pltpu.VMEM((B_BLK, HP), jnp.float32),           # c state
            ],
        ),
        # NOTE: for production tiles raise vmem_limit_bytes here (scoped VMEM
        # defaults: 16 MiB v5e / 32 MiB v6e-v7x).
        compiler_params=pltpu.CompilerParams(
            dimension_semantics=("parallel", "arbitrary")),
    )(blk_maxlen, x_blk, len2d, wih_p, whh_p, bias_p, w1_p, b1_p)

    return y_pad[:B, :out_size]


def rnn_encoder_reference(x, lengths, params):
    """Pure-JAX reference of the same forward (for correctness checking)."""
    B, T, d_in = x.shape
    H = params["w_hh"].shape[1]
    wih_t, whh_t = params["w_ih"].T, params["w_hh"].T
    bias = (params["b_ih"] + params["b_hh"]).reshape(1, 4 * H)

    def step(carry, x_t_and_t):
        h, c = carry
        x_t, t = x_t_and_t
        gates = x_t @ wih_t + h @ whh_t + bias
        i = jax.nn.sigmoid(gates[:, 0 * H:1 * H])
        f = jax.nn.sigmoid(gates[:, 1 * H:2 * H])
        g = jnp.tanh(gates[:, 2 * H:3 * H])
        o = jax.nn.sigmoid(gates[:, 3 * H:4 * H])
        c_new = f * c + i * g
        h_new = o * jnp.tanh(c_new)
        valid = (lengths > t)[:, None]
        h = jnp.where(valid, h_new, h)
        c = jnp.where(valid, c_new, c)
        return (h, c), None

    h0 = jnp.zeros((B, H), jnp.float32)
    c0 = jnp.zeros((B, H), jnp.float32)
    xs = (jnp.transpose(x, (1, 0, 2)), jnp.arange(T))
    (h_fin, _), _ = lax.scan(step, (h0, c0), xs)
    return h_fin @ params["w1"].T + params["b1"][None, :]


def init_params(key, in_size, hidden_size, out_size):
    """Deterministic synthetic params matching PyTorch LSTM/Linear shapes."""
    ks = jax.random.split(key, 6)
    k = 1.0 / jnp.sqrt(hidden_size)
    u = lambda kk, shape: jax.random.uniform(kk, shape, jnp.float32, -k, k)
    return {
        "w_ih": u(ks[0], (4 * hidden_size, in_size)),   # PyTorch gate order: i, f, g, o
        "w_hh": u(ks[1], (4 * hidden_size, hidden_size)),
        "b_ih": u(ks[2], (4 * hidden_size,)),
        "b_hh": u(ks[3], (4 * hidden_size,)),
        "w1":   u(ks[4], (out_size, hidden_size)),      # linear_1 weight
        "b1":   u(ks[5], (out_size,)),                  # linear_1 bias
    }


if __name__ == "__main__":
    B, T, IN_SIZE, HIDDEN, OUT_SIZE = 4, 8, 16, 32, 8

    key = jax.random.PRNGKey(0)
    k_x, k_p, k_x2 = jax.random.split(key, 3)
    x = jax.random.normal(k_x, (B, T, IN_SIZE), jnp.float32)
    lengths = jnp.array([8, 5, 3, 6], jnp.int32)        # varying valid lengths
    params = init_params(k_p, IN_SIZE, HIDDEN, OUT_SIZE)

    y_ref = rnn_encoder_reference(x, lengths, params)

    # f32 MXU path (exact-ish check)
    y = jax.block_until_ready(rnn_encoder_forward(x, lengths, params))
    assert y.shape == (B, OUT_SIZE)
    assert jnp.allclose(y, y_ref, atol=1e-4, rtol=1e-4), "f32 mismatch vs reference"

    # bf16 MXU operands, f32 accumulation + gate math (v6e/v7x fast path)
    y_bf16 = jax.block_until_ready(
        rnn_encoder_forward(x, lengths, params, mxu_dtype=jnp.bfloat16))
    assert jnp.allclose(y_bf16, y_ref, atol=3e-2, rtol=3e-2), "bf16 mismatch vs reference"

    # Larger ragged case: exercises multi-block (2 batch blocks, parallel axis),
    # multi-chunk time axis, chunk skipping and padded batch/time rows.
    B2, T2 = 20, 21
    x2 = jax.random.normal(k_x2, (B2, T2, IN_SIZE), jnp.float32)
    lengths2 = ((jnp.arange(B2, dtype=jnp.int32) * 5) % T2 + 1).astype(jnp.int32)
    y2 = jax.block_until_ready(rnn_encoder_forward(x2, lengths2, params))
    y2_ref = rnn_encoder_reference(x2, lengths2, params)
    assert y2.shape == (B2, OUT_SIZE)
    assert jnp.allclose(y2, y2_ref, atol=1e-4, rtol=1e-3), "ragged mismatch vs reference"

    print("KERNEL_OK")
</pallas_src>

<mosaic_0001>
module attributes {stable_mosaic.version = 11 : i64} {
  func.func @_lstm_encoder_kernel(%arg0: i32, %arg1: i32, %arg2: memref<1xi32, #tpu.memory_space<smem>>, %arg3: memref<1x8x8x16xf32, #tpu.memory_space<vmem>>, %arg4: memref<8x1xi32, #tpu.memory_space<vmem>>, %arg5: memref<16x512xf32, #tpu.memory_space<vmem>>, %arg6: memref<128x512xf32, #tpu.memory_space<vmem>>, %arg7: memref<1x512xf32, #tpu.memory_space<vmem>>, %arg8: memref<128x128xf32, #tpu.memory_space<vmem>>, %arg9: memref<1x128xf32, #tpu.memory_space<vmem>>, %arg10: memref<8x128xf32, #tpu.memory_space<vmem>>, %arg11: memref<8x8x512xf32, #tpu.memory_space<vmem>>, %arg12: memref<8x128xf32, #tpu.memory_space<vmem>>, %arg13: memref<8x128xf32, #tpu.memory_space<vmem>>) attributes {dimension_semantics = [#tpu.dimension_semantics<parallel>, #tpu.dimension_semantics<arbitrary>], iteration_bounds = array<i64: 1, 1>, scalar_prefetch = 1 : i64, scratch_operands = 3 : i64, tpu.core_type = #tpu.core_type<tc>, window_params = [{transform_indices = @transform_0, window_bounds = array<i64: 1, 8, 8, 16>}, {transform_indices = @transform_1, window_bounds = array<i64: 8, 1>}, {pipeline_mode = #tpu.pipeline_mode<synchronous>, transform_indices = @transform_2, window_bounds = array<i64: 16, 512>}, {pipeline_mode = #tpu.pipeline_mode<synchronous>, transform_indices = @transform_3, window_bounds = array<i64: 128, 512>}, {pipeline_mode = #tpu.pipeline_mode<synchronous>, transform_indices = @transform_4, window_bounds = array<i64: 1, 512>}, {pipeline_mode = #tpu.pipeline_mode<synchronous>, transform_indices = @transform_5, window_bounds = array<i64: 128, 128>}, {pipeline_mode = #tpu.pipeline_mode<synchronous>, transform_indices = @transform_6, window_bounds = array<i64: 1, 128>}, {transform_indices = @transform_7, window_bounds = array<i64: 8, 128>}]} {
    %c0_i32 = arith.constant 0 : i32
    %0 = arith.cmpi eq, %arg1, %c0_i32 : i32
    %1 = arith.extui %0 : i1 to i32
    %c0_i32_0 = arith.constant 0 : i32
    %2 = arith.cmpi ne, %1, %c0_i32_0 : i32
    scf.if %2 {
      %cst = arith.constant 0.000000e+00 : f32
      %14 = vector.broadcast %cst : f32 to vector<8x128xf32>
      %c0 = arith.constant 0 : index
      %c0_6 = arith.constant 0 : index
      %15 = vector.load %arg12[%c0, %c0_6] : memref<8x128xf32, #tpu.memory_space<vmem>>, vector<8x128xf32>
      tpu.vector_store %arg12[%c0, %c0_6], %14 {strides = array<i32>} : memref<8x128xf32, #tpu.memory_space<vmem>>, vector<8x128xf32>,
      %cst_7 = arith.constant 0.000000e+00 : f32
      %16 = vector.broadcast %cst_7 : f32 to vector<8x128xf32>
      %c0_8 = arith.constant 0 : index
      %c0_9 = arith.constant 0 : index
      %17 = vector.load %arg13[%c0_8, %c0_9] : memref<8x128xf32, #tpu.memory_space<vmem>>, vector<8x128xf32>
      tpu.vector_store %arg13[%c0_8, %c0_9], %16 {strides = array<i32>} : memref<8x128xf32, #tpu.memory_space<vmem>>, vector<8x128xf32>,
    } else {
    }
    %c8_i32 = arith.constant 8 : i32
    %3 = arith.muli %arg1, %c8_i32 : i32
    %4 = arith.index_cast %arg0 : i32 to index
    %5 = memref.load %arg2[%4] : memref<1xi32, #tpu.memory_space<smem>>
    %6 = arith.subi %5, %3 : i32
    %c8_i32_1 = arith.constant 8 : i32
    %7 = arith.minsi %6, %c8_i32_1 : i32
    %c0_i32_2 = arith.constant 0 : i32
    %8 = arith.cmpi sgt, %7, %c0_i32_2 : i32
    %9 = arith.extui %8 : i1 to i32
    %c0_i32_3 = arith.constant 0 : i32
    %10 = arith.cmpi ne, %9, %c0_i32_3 : i32
    scf.if %10 {
      %c0 = arith.constant 0 : index
      %c0_6 = arith.constant 0 : index
      %c0_7 = arith.constant 0 : index
      %c0_8 = arith.constant 0 : index
      %14 = vector.load %arg3[%c0, %c0_6, %c0_7, %c0_8] : memref<1x8x8x16xf32, #tpu.memory_space<vmem>>, vector<1x8x8x16xf32>
      %15 = vector.shape_cast %14 : vector<1x8x8x16xf32> to vector<8x8x16xf32>
      %16 = vector.shape_cast %15 : vector<8x8x16xf32> to vector<64x16xf32>
      %c0_9 = arith.constant 0 : index
      %c0_10 = arith.constant 0 : index
      %17 = vector.load %arg5[%c0_9, %c0_10] : memref<16x512xf32, #tpu.memory_space<vmem>>, vector<16x512xf32>
      %cst = arith.constant dense<0.000000e+00> : vector<64x512xf32>
      %18 = tpu.matmul %16, %17, %cst {dimension_numbers = #tpu.dot_dimension_numbers<[1], [0], [0], [1], [0, 0, 1, 1], [], []>} : vector<64x16xf32>, vector<16x512xf32>, vector<64x512xf32> -> vector<64x512xf32>
      %c0_11 = arith.constant 0 : index
      %c0_12 = arith.constant 0 : index
      %19 = vector.load %arg7[%c0_11, %c0_12] : memref<1x512xf32, #tpu.memory_space<vmem>>, vector<1x512xf32>
      %20 = vector.broadcast %19 : vector<1x512xf32> to vector<64x512xf32>
      %21 = arith.addf %18, %20 : vector<64x512xf32>
      %22 = vector.shape_cast %21 : vector<64x512xf32> to vector<8x8x512xf32>
      %c0_13 = arith.constant 0 : index
      %c0_14 = arith.constant 0 : index
      %c0_15 = arith.constant 0 : index
      %23 = vector.load %arg11[%c0_13, %c0_14, %c0_15] : memref<8x8x512xf32, #tpu.memory_space<vmem>>, vector<8x8x512xf32>
      tpu.vector_store %arg11[%c0_13, %c0_14, %c0_15], %22 {strides = array<i32>} : memref<8x8x512xf32, #tpu.memory_space<vmem>>, vector<8x8x512xf32>,
      %c0_16 = arith.constant 0 : index
      %c0_17 = arith.constant 0 : index
      %24 = vector.load %arg4[%c0_16, %c0_17] : memref<8x1xi32, #tpu.memory_space<vmem>>, vector<8x1xi32>
      %c0_18 = arith.constant 0 : index
      %c0_19 = arith.constant 0 : index
      %25 = vector.load %arg12[%c0_18, %c0_19] : memref<8x128xf32, #tpu.memory_space<vmem>>, vector<8x128xf32>
      %c0_20 = arith.constant 0 : index
      %c0_21 = arith.constant 0 : index
      %26 = vector.load %arg13[%c0_20, %c0_21] : memref<8x128xf32, #tpu.memory_space<vmem>>, vector<8x128xf32>
      %c0_i32_22 = arith.constant 0 : i32
      %27 = arith.subi %7, %c0_i32_22 : i32
      %28 = arith.addi %c0_i32_22, %27 : i32
      %c1_i32 = arith.constant 1 : i32
      %29:2 = scf.for %arg14 = %c0_i32_22 to %28 step %c1_i32 iter_args(%arg15 = %25, %arg16 = %26) -> (vector<8x128xf32>, vector<8x128xf32>)  : i32 {
        %32 = arith.index_cast %arg14 : i32 to index
        %c0_27 = arith.constant 0 : index
        %c0_28 = arith.constant 0 : index
        %33 = vector.load %arg11[%32, %c0_27, %c0_28] : memref<8x8x512xf32, #tpu.memory_space<vmem>>, vector<1x8x512xf32>
        %34 = vector.shape_cast %33 : vector<1x8x512xf32> to vector<8x512xf32>
        %c0_29 = arith.constant 0 : index
        %c0_30 = arith.constant 0 : index
        %35 = vector.load %arg6[%c0_29, %c0_30] : memref<128x512xf32, #tpu.memory_space<vmem>>, vector<128x512xf32>
        %cst_31 = arith.constant dense<0.000000e+00> : vector<8x512xf32>
        %36 = tpu.matmul %arg15, %35, %cst_31 {dimension_numbers = #tpu.dot_dimension_numbers<[1], [0], [0], [1], [0, 0, 1, 1], [], []>} : vector<8x128xf32>, vector<128x512xf32>, vector<8x512xf32> -> vector<8x512xf32>
        %37 = arith.addf %34, %36 : vector<8x512xf32>
        %38 = vector.extract_strided_slice %37 {offsets = [0, 0], sizes = [8, 384], strides = [1, 1]} : vector<8x512xf32> to vector<8x384xf32>
        %39 = arith.negf %38 : vector<8x384xf32>
        %40 = math.exp %39 : vector<8x384xf32>
        %cst_32 = arith.constant 1.000000e+00 : f32
        %41 = vector.broadcast %cst_32 : f32 to vector<8x384xf32>
        %42 = arith.addf %41, %40 : vector<8x384xf32>
        %43 = arith.divf %41, %42 : vector<8x384xf32>
        %44 = vector.extract_strided_slice %43 {offsets = [0, 0], sizes = [8, 128], strides = [1, 1]} : vector<8x384xf32> to vector<8x128xf32>
        %45 = vector.extract_strided_slice %43 {offsets = [0, 128], sizes = [8, 128], strides = [1, 1]} : vector<8x384xf32> to vector<8x128xf32>
        %46 = vector.extract_strided_slice %43 {offsets = [0, 256], sizes = [8, 128], strides = [1, 1]} : vector<8x384xf32> to vector<8x128xf32>
        %47 = vector.extract_strided_slice %37 {offsets = [0, 384], sizes = [8, 128], strides = [1, 1]} : vector<8x512xf32> to vector<8x128xf32>
        %48 = math.tanh %47 : vector<8x128xf32>
        %49 = arith.mulf %45, %arg16 : vector<8x128xf32>
        %50 = arith.mulf %44, %48 : vector<8x128xf32>
        %51 = arith.addf %49, %50 : vector<8x128xf32>
        %52 = math.tanh %51 : vector<8x128xf32>
        %53 = arith.mulf %46, %52 : vector<8x128xf32>
        %54 = arith.addi %3, %arg14 : i32
        %55 = vector.broadcast %54 : i32 to vector<8x1xi32>
        %56 = arith.cmpi sgt, %24, %55 : vector<8x1xi32>
        %57 = vector.shape_cast %56 : vector<8x1xi1> to vector<8x1xi1>
        %58 = vector.broadcast %57 : vector<8x1xi1> to vector<8x128xi1>
        %59 = arith.select %58, %53, %arg15 : vector<8x128xi1>, vector<8x128xf32>
        %60 = vector.shape_cast %56 : vector<8x1xi1> to vector<8x1xi1>
        %61 = vector.broadcast %60 : vector<8x1xi1> to vector<8x128xi1>
        %62 = arith.select %61, %51, %arg16 : vector<8x128xi1>, vector<8x128xf32>
        scf.yield %59, %62 : vector<8x128xf32>, vector<8x128xf32>
      }
      %c0_23 = arith.constant 0 : index
      %c0_24 = arith.constant 0 : index
      %30 = vector.load %arg12[%c0_23, %c0_24] : memref<8x128xf32, #tpu.memory_space<vmem>>, vector<8x128xf32>
      tpu.vector_store %arg12[%c0_23, %c0_24], %29#0 {strides = array<i32>} : memref<8x128xf32, #tpu.memory_space<vmem>>, vector<8x128xf32>,
      %c0_25 = arith.constant 0 : index
      %c0_26 = arith.constant 0 : index
      %31 = vector.load %arg13[%c0_25, %c0_26] : memref<8x128xf32, #tpu.memory_space<vmem>>, vector<8x128xf32>
      tpu.vector_store %arg13[%c0_25, %c0_26], %29#1 {strides = array<i32>} : memref<8x128xf32, #tpu.memory_space<vmem>>, vector<8x128xf32>,
    } else {
    }
    %c0_i32_4 = arith.constant 0 : i32
    %11 = arith.cmpi eq, %arg1, %c0_i32_4 : i32
    %12 = arith.extui %11 : i1 to i32
    %c0_i32_5 = arith.constant 0 : i32
    %13 = arith.cmpi ne, %12, %c0_i32_5 : i32
    scf.if %13 {
      %c0 = arith.constant 0 : index
      %c0_6 = arith.constant 0 : index
      %14 = vector.load %arg12[%c0, %c0_6] : memref<8x128xf32, #tpu.memory_space<vmem>>, vector<8x128xf32>
      %c0_7 = arith.constant 0 : index
      %c0_8 = arith.constant 0 : index
      %15 = vector.load %arg8[%c0_7, %c0_8] : memref<128x128xf32, #tpu.memory_space<vmem>>, vector<128x128xf32>
      %cst = arith.constant dense<0.000000e+00> : vector<8x128xf32>
      %16 = tpu.matmul %14, %15, %cst {dimension_numbers = #tpu.dot_dimension_numbers<[1], [0], [0], [1], [0, 0, 1, 1], [], []>} : vector<8x128xf32>, vector<128x128xf32>, vector<8x128xf32> -> vector<8x128xf32>
      %c0_9 = arith.constant 0 : index
      %c0_10 = arith.constant 0 : index
      %17 = vector.load %arg9[%c0_9, %c0_10] : memref<1x128xf32, #tpu.memory_space<vmem>>, vector<1x128xf32>
      %18 = vector.broadcast %17 : vector<1x128xf32> to vector<8x128xf32>
      %19 = arith.addf %16, %18 : vector<8x128xf32>
      %c0_11 = arith.constant 0 : index
      %c0_12 = arith.constant 0 : index
      %20 = vector.load %arg10[%c0_11, %c0_12] : memref<8x128xf32, #tpu.memory_space<vmem>>, vector<8x128xf32>
      tpu.vector_store %arg10[%c0_11, %c0_12], %19 {strides = array<i32>} : memref<8x128xf32, #tpu.memory_space<vmem>>, vector<8x128xf32>,
    } else {
    }
    return
  }
  func.func @transform_0(%arg0: i32, %arg1: i32, %arg2: memref<1xi32, #tpu.memory_space<smem>>) -> (i32, i32, i32, i32) {
    %c0_i32 = arith.constant 0 : i32
    %c0_i32_0 = arith.constant 0 : i32
    %c0_i32_1 = arith.constant 0 : i32
    return %arg0, %arg1, %c0_i32, %c0_i32_0 : i32, i32, i32, i32
  }
  func.func @transform_1(%arg0: i32, %arg1: i32, %arg2: memref<1xi32, #tpu.memory_space<smem>>) -> (i32, i32) {
    %c0_i32 = arith.constant 0 : i32
    %c0_i32_0 = arith.constant 0 : i32
    return %arg0, %c0_i32 : i32, i32
  }
  func.func @transform_2(%arg0: i32, %arg1: i32, %arg2: memref<1xi32, #tpu.memory_space<smem>>) -> (i32, i32) {
    %c0_i32 = arith.constant 0 : i32
    %c0_i32_0 = arith.constant 0 : i32
    %c0_i32_1 = arith.constant 0 : i32
    return %c0_i32, %c0_i32_0 : i32, i32
  }
  func.func @transform_3(%arg0: i32, %arg1: i32, %arg2: memref<1xi32, #tpu.memory_space<smem>>) -> (i32, i32) {
    %c0_i32 = arith.constant 0 : i32
    %c0_i32_0 = arith.constant 0 : i32
    %c0_i32_1 = arith.constant 0 : i32
    return %c0_i32, %c0_i32_0 : i32, i32
  }
  func.func @transform_4(%arg0: i32, %arg1: i32, %arg2: memref<1xi32, #tpu.memory_space<smem>>) -> (i32, i32) {
    %c0_i32 = arith.constant 0 : i32
    %c0_i32_0 = arith.constant 0 : i32
    %c0_i32_1 = arith.constant 0 : i32
    return %c0_i32, %c0_i32_0 : i32, i32
  }
  func.func @transform_5(%arg0: i32, %arg1: i32, %arg2: memref<1xi32, #tpu.memory_space<smem>>) -> (i32, i32) {
    %c0_i32 = arith.constant 0 : i32
    %c0_i32_0 = arith.constant 0 : i32
    %c0_i32_1 = arith.constant 0 : i32
    return %c0_i32, %c0_i32_0 : i32, i32
  }
  func.func @transform_6(%arg0: i32, %arg1: i32, %arg2: memref<1xi32, #tpu.memory_space<smem>>) -> (i32, i32) {
    %c0_i32 = arith.constant 0 : i32
    %c0_i32_0 = arith.constant 0 : i32
    %c0_i32_1 = arith.constant 0 : i32
    return %c0_i32, %c0_i32_0 : i32, i32
  }
  func.func @transform_7(%arg0: i32, %arg1: i32, %arg2: memref<1xi32, #tpu.memory_space<smem>>) -> (i32, i32) {
    %c0_i32 = arith.constant 0 : i32
    %c0_i32_0 = arith.constant 0 : i32
    return %arg0, %c0_i32 : i32, i32
  }
}

</mosaic_0001>

<bundles_post_ra>
// kernel: tpu_custom_call.1
= control target key start
LH: loop header
LB: loop body
LE: loop exit
PB: predicated region body
PF: predicated region fallthrough
CT: control target
= control target key end

     0   :  { %14 = vsyncpa [#allocation8], 0  ;;  %s1169_s0 = inlined_call_operand.<no memory space> [shape: s32[1], index: 0, kind: input, shape index: {}]   ;;  %s1170_s1 = inlined_call_operand.hbm [shape: f32[1,8,8,16], index: 1, kind: input, shape index: {}]   ;;  %s1171_s2 = inlined_call_operand.vmem [shape: s32[8,1], index: 2, kind: input, shape index: {}]   ;;  %s1172_s3 = inlined_call_operand.hbm [shape: f32[16,512], index: 3, kind: input, shape index: {}]   ;;  %s1173_s4 = inlined_call_operand.hbm [shape: f32[128,512], index: 4, kind: input, shape index: {}]   ;;  %s1174_s5 = inlined_call_operand.vmem [shape: f32[1,512], index: 5, kind: input, shape index: {}]   ;;  %s1175_s6 = inlined_call_operand.hbm [shape: f32[128,128], index: 6, kind: input, shape index: {}]   ;;  %s1176_s7 = inlined_call_operand.vmem [shape: f32[1,128], index: 7, kind: input, shape index: {}]   ;;  %s1177_s8 = inlined_call_operand.hbm [shape: f32[8,128], index: 8, kind: output, shape index: {}]  }
   0x1   :  { %15 = vsyncpa [#allocation11], 0 }
   0x2   :  { %16 = vsyncpa [#allocation14], 0  ;;  %s37_s29 = sshll.u32 %s1172_s3, 4  ;;  %s38_s29 = int_to_ptr.hbm [resolvable:$true] %s37_s29 }
   0x3   :  { %17 = vsyncpa [#allocation9], 0  ;;  %s956_s30 = smov [#allocation10]   ;;  %s22_s12 = sshll.u32 %s1170_s1, 4  ;;  %s23_s12 = int_to_ptr.hbm [resolvable:$true] %s22_s12 }
   0x4   :  { %s39_s9 = sshll.u32 %s956_s30, 4  ;;  %s957_s13 = smov 512   ;;  %s40_s9 = int_to_ptr.vmem [resolvable:$true] %s39_s9 }
   0x5   :  { %s958_s14 = smov 32   ;;  %s959_s15 = smov [#allocation7]  }
   0x6   :  { %45 = dma.hbm_to_vmem [thread:$0]  %s38_s29, 1024, %s40_s9, [#allocation11], %s957_s13, %s957_s13, %s958_s14  }
   0x7   :  { %s24_s16 = sshll.u32 %s959_s15, 4  ;;  %s960_s17 = smov 128   ;;  %s25_s16 = int_to_ptr.vmem [resolvable:$true] %s24_s16 }
   0x8   :  { %s961_s18 = smov 8   ;;  %s50_s20 = sshll.u32 %s1173_s4, 4  ;;  %s51_s20 = int_to_ptr.hbm [resolvable:$true] %s50_s20 }
   0x9   :  { %30 = dma.hbm_to_vmem [thread:$0]  %s23_s12, 1024, %s25_s16, [#allocation8], %s960_s17, %s960_s17, %s961_s18  }
   0xa   :  { %s962_s21 = smov [#allocation12]   ;;  %s65_s24 = sshll.u32 %s1175_s6, 4  ;;  %s66_s24 = int_to_ptr.hbm [resolvable:$true] %s65_s24 }
   0xb   :  { %s52_s22 = sshll.u32 %s962_s21, 4  ;;  %s963_s25 = smov [#allocation13]   ;;  %s53_s22 = int_to_ptr.vmem [resolvable:$true] %s52_s22 }
   0xc   :  { %58 = dma.hbm_to_vmem [thread:$0]  %s51_s20, 8192, %s53_s22, [#allocation11], %s957_s13, %s957_s13, %s958_s14  }
   0xd   :  { %s67_s26 = sshll.u32 %s963_s25, 4  ;;  %s68_s26 = int_to_ptr.vmem [resolvable:$true] %s67_s26 }
   0xe   :  { %73 = dma.hbm_to_vmem [thread:$0]  %s66_s24, 2048, %s68_s26, [#allocation14], %s960_s17, %s960_s17, %s961_s18  }
   0xf   :  { %928 = dma.done.wait [#allocation8], 1024  }
  0x10   :  { %929 = vsyncadd [#allocation8], 4294966272 }
  0x11   :  { %930 = dma.done.wait [#allocation11], 9216  }
  0x12   :  { %931 = vsyncadd [#allocation11], 4294958080 }
  0x13   :  { %932 = dma.done.wait [#allocation14], 2048  }
  0x14   :  { %933 = vsyncadd [#allocation14], 4294965248  ;;  %p101_p0 = scmp.lt.s32.totalorder %s1169_s0, 8  ;;  %p672_p1 = scmp.gt.s32.totalorder %s1169_s0, 0  ;;  %v964_v0 = vmov 0.0  }
  0x15   :  { %96 = vst [vmem:[#allocation3] sm:$0xff] %v964_v0  ;;  %v121_v1 = vld [vmem:[#allocation10 + $0x30] sm:$0xff] (%p672_p1)  ;;  %v122_v2 = vld [vmem:[#allocation10 + $0x38] sm:$0xff] (%p672_p1)  ;;  %v107_v5 = vld [vmem:[#allocation7] sm:$0xff] (%p672_p1)  ;;  %vm133_vm0 = vcmask (%p672_p1), 130048   ;;  %p715_p2 = scmp.le.s32.totalorder (%p672_p1), %s1169_s0, 0 }
  0x16   :  { %97 = vst [vmem:[#allocation4] sm:$0xff] %v964_v0  ;;  %s1033_s9 = scalar_select %p101_p0, %s1169_s0, 8  ;;  %v117_v3 = vld [vmem:[#allocation10 + $0x10] sm:$0xff] (%p672_p1)  ;;  %254 = vmatpush.msra.mxu2 (%p672_p1), %v121_v1  ;;  %295 = vmatpush.msra.mxu3 (%p672_p1), %v122_v2  ;;  %v118_v4 = vld [vmem:[#allocation10 + $0x18] sm:$0xff] (%p672_p1)  ;;  %v119_v6 = vld [vmem:[#allocation10 + $0x20] sm:$0xff] (%p672_p1) }
  0x17   :  { %106 = sbr.rel (!%p672_p1) target bundleno = 423 (0x1a7), region = 53  ;;  %172 = vmatpush.msra.mxu0 (%p672_p1), %v119_v6  ;;  %v120_v7 = vld [vmem:[#allocation10 + $0x28] sm:$0xff] (%p672_p1)  ;;  %v115_v8 = vld [vmem:[#allocation10] sm:$0xff] (%p672_p1)  ;;  %v109_v11 = vld [vmem:[#allocation7 + $0x10] sm:$0xff] (%p672_p1) }
  0x18   :  { %255 = vmatpush.msra.mxu2 (%p672_p1), %v117_v3  ;;  %296 = vmatpush.msra.mxu3 (%p672_p1), %v118_v4  ;;  %v116_v9 = vld [vmem:[#allocation10 + $0x8] sm:$0xff] (%p672_p1)  ;;  %v110_v12 = vld [vmem:[#allocation7 + $0x18] sm:$0xff] (%p672_p1)  ;;  %v111_v13 = vld [vmem:[#allocation7 + $0x20] sm:$0xff] (%p672_p1) }
  0x19   :  { %692 = vmatmul.msk.f32.vlgmr.msra.gmra.mxu2 (%p672_p1), %vm133_vm0, %v107_v5  ;;  %700 = vmatmul.msk.f32.vlgmr.msra.gmra.mxu3 (%p672_p1), %vm133_vm0, %v107_v5  ;;  %v108_v10 = vld [vmem:[#allocation7 + $0x8] sm:$0xff] (%p672_p1)  ;;  %v113_v15 = vld [vmem:[#allocation7 + $0x30] sm:$0xff] (%p672_p1)  ;;  %v114_v16 = vld [vmem:[#allocation7 + $0x38] sm:$0xff] (%p672_p1) }
  0x1a   :  { %213 = vmatpush.msra.mxu1 (%p672_p1), %v120_v7  ;;  %173 = vmatpush.msra.mxu0 (%p672_p1), %v115_v8  ;;  %v112_v14 = vld [vmem:[#allocation7 + $0x28] sm:$0xff] (%p672_p1)  ;;  %v123_v17 = vld [vmem:[%s1174_s5] sm:$0xf] (%p672_p1) }
  0x1b   :  { %676 = vmatmul.msk.f32.vlgmr.msra.gmra.mxu0 (%p672_p1), %vm133_vm0, %v107_v5  ;;  %v1070_v18 = vperm.slane (%p672_p1), %v123_v17, 0  ;;  %v1072_v19 = vperm.slane (%p672_p1), %v123_v17, 1  ;;  %v1075_v22 = vperm.slane (%p672_p1), %v123_v17, 2  ;;  %v1077_v23 = vperm.slane (%p672_p1), %v123_v17, 3  ;;  %v1097_v55 = vld [vmem:[%s1171_s2] sm:$0xff] (%p672_p1) }
  0x1c   :  { %214 = vmatpush.msra.mxu1 %v116_v9  ;;  %v355_v56 = vld [vmem:[#allocation3] sm:$0xff]   ;;  %s1126_s14 = smov (!%p715_p2), 0  }
  0x1d   :  { %684 = vmatmul.msk.f32.vlgmr.msra.gmra.mxu1 %vm133_vm0, %v107_v5  ;;  %v356_v57 = vld [vmem:[#allocation4] sm:$0xff]  }
  0x21   :  { %693 = vmatmul.msk.f32.gmra.mxu2 %vm133_vm0, %v108_v10  ;;  %701 = vmatmul.msk.f32.gmra.mxu3 %vm133_vm0, %v108_v10 }
  0x23   :  { %677 = vmatmul.msk.f32.gmra.mxu0 %vm133_vm0, %v108_v10 }
  0x25   :  { %685 = vmatmul.msk.f32.gmra.mxu1 %vm133_vm0, %v108_v10 }
  0x29   :  { %694 = vmatmul.msk.f32.gmra.mxu2 %vm133_vm0, %v109_v11  ;;  %702 = vmatmul.msk.f32.gmra.mxu3 %vm133_vm0, %v109_v11 }
  0x2b   :  { %678 = vmatmul.msk.f32.gmra.mxu0 %vm133_vm0, %v109_v11 }
  0x2d   :  { %686 = vmatmul.msk.f32.gmra.mxu1 %vm133_vm0, %v109_v11 }
  0x31   :  { %695 = vmatmul.msk.f32.gmra.mxu2 %vm133_vm0, %v110_v12  ;;  %703 = vmatmul.msk.f32.gmra.mxu3 %vm133_vm0, %v110_v12 }
  0x33   :  { %679 = vmatmul.msk.f32.gmra.mxu0 %vm133_vm0, %v110_v12 }
  0x35   :  { %687 = vmatmul.msk.f32.gmra.mxu1 %vm133_vm0, %v110_v12 }
  0x39   :  { %696 = vmatmul.msk.f32.gmra.mxu2 %vm133_vm0, %v111_v13  ;;  %704 = vmatmul.msk.f32.gmra.mxu3 %vm133_vm0, %v111_v13 }
  0x3b   :  { %680 = vmatmul.msk.f32.gmra.mxu0 %vm133_vm0, %v111_v13 }
  0x3d   :  { %688 = vmatmul.msk.f32.gmra.mxu1 %vm133_vm0, %v111_v13 }
  0x41   :  { %697 = vmatmul.msk.f32.gmra.mxu2 %vm133_vm0, %v112_v14  ;;  %705 = vmatmul.msk.f32.gmra.mxu3 %vm133_vm0, %v112_v14 }
  0x43   :  { %681 = vmatmul.msk.f32.gmra.mxu0 %vm133_vm0, %v112_v14 }
  0x45   :  { %689 = vmatmul.msk.f32.gmra.mxu1 %vm133_vm0, %v112_v14 }
  0x49   :  { %698 = vmatmul.msk.f32.gmra.mxu2 %vm133_vm0, %v113_v15  ;;  %706 = vmatmul.msk.f32.gmra.mxu3 %vm133_vm0, %v113_v15 }
  0x4b   :  { %682 = vmatmul.msk.f32.gmra.mxu0 %vm133_vm0, %v113_v15 }
  0x4d   :  { %690 = vmatmul.msk.f32.gmra.mxu1 %vm133_vm0, %v113_v15 }
  0x51   :  { %699 = vmatmul.msk.f32.gmra.mxu2 %vm133_vm0, %v114_v16  ;;  %707 = vmatmul.msk.f32.gmra.mxu3 %vm133_vm0, %v114_v16 }
  0x53   :  { %683 = vmatmul.msk.f32.gmra.mxu0 %vm133_vm0, %v114_v16 }
  0x55   :  { %691 = vmatmul.msk.f32.gmra.mxu1 %vm133_vm0, %v114_v16 }
  0x98   :  { %v175_v20 = vpop.f32.mrf.mxu0 }
  0x99   :  { %v176_v21 = vadd.f32 %v175_v20, %v1070_v18 }
  0x9a   :  { %v216_v24 = vpop.f32.mrf.mxu1 }
  0x9b   :  { %322 = vst [vmem:[#allocation2] sm:$0xff] %v176_v21  ;;  %v217_v25 = vadd.f32 %v216_v24, %v1072_v19 }
  0x9c   :  { %v257_v26 = vpop.f32.mrf.mxu2  ;;  %v298_v27 = vpop.f32.mrf.mxu3 }
  0x9d   :  { %323 = vst [vmem:[#allocation2 + $0x8] sm:$0xff] %v217_v25  ;;  %v258_v28 = vadd.f32 %v257_v26, %v1075_v22  ;;  %v299_v29 = vadd.f32 %v298_v27, %v1077_v23 }
  0x9f   :  { %324 = vst [vmem:[#allocation2 + $0x10] sm:$0xff] %v258_v28 }
  0xa0   :  { %325 = vst [vmem:[#allocation2 + $0x18] sm:$0xff] %v299_v29  ;;  %v178_v30 = vpop.f32.mrf.mxu0  ;;  %v1178_v29 = vmov %v356_v57 }
  0xa1   :  { %v179_v31 = vadd.f32 %v178_v30, %v1070_v18 }
  0xa2   :  { %v219_v32 = vpop.f32.mrf.mxu1 }
  0xa3   :  { %326 = vst [vmem:[#allocation2 + $0x20] sm:$0xff] %v179_v31  ;;  %v220_v33 = vadd.f32 %v219_v32, %v1072_v19 }
  0xa4   :  { %v260_v34 = vpop.f32.mrf.mxu2  ;;  %v301_v35 = vpop.f32.mrf.mxu3 }
  0xa5   :  { %327 = vst [vmem:[#allocation2 + $0x28] sm:$0xff] %v220_v33  ;;  %v261_v36 = vadd.f32 %v260_v34, %v1075_v22  ;;  %v302_v37 = vadd.f32 %v301_v35, %v1077_v23 }
  0xa7   :  { %328 = vst [vmem:[#allocation2 + $0x30] sm:$0xff] %v261_v36 }
  0xa8   :  { %329 = vst [vmem:[#allocation2 + $0x38] sm:$0xff] %v302_v37  ;;  %v181_v38 = vpop.f32.mrf.mxu0 }
  0xa9   :  { %v182_v39 = vadd.f32 %v181_v38, %v1070_v18 }
  0xaa   :  { %v222_v40 = vpop.f32.mrf.mxu1 }
  0xab   :  { %330 = vst [vmem:[#allocation2 + $0x40] sm:$0xff] %v182_v39  ;;  %v223_v41 = vadd.f32 %v222_v40, %v1072_v19 }
  0xac   :  { %v263_v42 = vpop.f32.mrf.mxu2  ;;  %v304_v43 = vpop.f32.mrf.mxu3 }
  0xad   :  { %331 = vst [vmem:[#allocation2 + $0x48] sm:$0xff] %v223_v41  ;;  %v264_v44 = vadd.f32 %v263_v42, %v1075_v22  ;;  %v305_v45 = vadd.f32 %v304_v43, %v1077_v23 }
  0xaf   :  { %332 = vst [vmem:[#allocation2 + $0x50] sm:$0xff] %v264_v44 }
  0xb0   :  { %333 = vst [vmem:[#allocation2 + $0x58] sm:$0xff] %v305_v45  ;;  %v184_v46 = vpop.f32.mrf.mxu0 }
  0xb1   :  { %v185_v47 = vadd.f32 %v184_v46, %v1070_v18 }
  0xb2   :  { %v225_v48 = vpop.f32.mrf.mxu1 }
  0xb3   :  { %334 = vst [vmem:[#allocation2 + $0x60] sm:$0xff] %v185_v47  ;;  %v226_v49 = vadd.f32 %v225_v48, %v1072_v19 }
  0xb4   :  { %v266_v50 = vpop.f32.mrf.mxu2  ;;  %v307_v51 = vpop.f32.mrf.mxu3 }
  0xb5   :  { %335 = vst [vmem:[#allocation2 + $0x68] sm:$0xff] %v226_v49  ;;  %v267_v52 = vadd.f32 %v266_v50, %v1075_v22  ;;  %v308_v53 = vadd.f32 %v307_v51, %v1077_v23 }
  0xb7   :  { %336 = vst [vmem:[#allocation2 + $0x70] sm:$0xff] %v267_v52 }
  0xb8   :  { %337 = vst [vmem:[#allocation2 + $0x78] sm:$0xff] %v308_v53  ;;  %v187_v54 = vpop.f32.mrf.mxu0 }
  0xb9   :  { %v188_v58 = vadd.f32 %v187_v54, %v1070_v18 }
  0xba   :  { %v228_v59 = vpop.f32.mrf.mxu1 }
  0xbb   :  { %338 = vst [vmem:[#allocation2 + $0x80] sm:$0xff] %v188_v58  ;;  %v229_v60 = vadd.f32 %v228_v59, %v1072_v19 }
  0xbc   :  { %v269_v61 = vpop.f32.mrf.mxu2  ;;  %v310_v62 = vpop.f32.mrf.mxu3 }
  0xbd   :  { %339 = vst [vmem:[#allocation2 + $0x88] sm:$0xff] %v229_v60  ;;  %v270_v63 = vadd.f32 %v269_v61, %v1075_v22  ;;  %v311_v0 = vadd.f32 %v310_v62, %v1077_v23 }
  0xbf   :  { %340 = vst [vmem:[#allocation2 + $0x90] sm:$0xff] %v270_v63 }
  0xc0   :  { %341 = vst [vmem:[#allocation2 + $0x98] sm:$0xff] %v311_v0  ;;  %v190_v1 = vpop.f32.mrf.mxu0 }
  0xc1   :  { %v191_v2 = vadd.f32 %v190_v1, %v1070_v18 }
  0xc2   :  { %v231_v3 = vpop.f32.mrf.mxu1 }
  0xc3   :  { %342 = vst [vmem:[#allocation2 + $0xa0] sm:$0xff] %v191_v2  ;;  %v232_v4 = vadd.f32 %v231_v3, %v1072_v19 }
  0xc4   :  { %v272_v5 = vpop.f32.mrf.mxu2  ;;  %v313_v6 = vpop.f32.mrf.mxu3 }
  0xc5   :  { %343 = vst [vmem:[#allocation2 + $0xa8] sm:$0xff] %v232_v4  ;;  %v273_v7 = vadd.f32 %v272_v5, %v1075_v22  ;;  %v314_v8 = vadd.f32 %v313_v6, %v1077_v23 }
  0xc7   :  { %344 = vst [vmem:[#allocation2 + $0xb0] sm:$0xff] %v273_v7 }
  0xc8   :  { %345 = vst [vmem:[#allocation2 + $0xb8] sm:$0xff] %v314_v8  ;;  %v193_v9 = vpop.f32.mrf.mxu0 }
  0xc9   :  { %v194_v10 = vadd.f32 %v193_v9, %v1070_v18 }
  0xca   :  { %v234_v11 = vpop.f32.mrf.mxu1 }
  0xcb   :  { %346 = vst [vmem:[#allocation2 + $0xc0] sm:$0xff] %v194_v10  ;;  %v235_v12 = vadd.f32 %v234_v11, %v1072_v19 }
  0xcc   :  { %v275_v13 = vpop.f32.mrf.mxu2  ;;  %v316_v14 = vpop.f32.mrf.mxu3 }
  0xcd   :  { %347 = vst [vmem:[#allocation2 + $0xc8] sm:$0xff] %v235_v12  ;;  %v276_v15 = vadd.f32 %v275_v13, %v1075_v22  ;;  %v317_v16 = vadd.f32 %v316_v14, %v1077_v23 }
  0xcf   :  { %348 = vst [vmem:[#allocation2 + $0xd0] sm:$0xff] %v276_v15 }
  0xd0   :  { %349 = vst [vmem:[#allocation2 + $0xd8] sm:$0xff] %v317_v16  ;;  %v196_v17 = vpop.f32.mrf.mxu0 }
  0xd1   :  { %v197_v20 = vadd.f32 %v196_v17, %v1070_v18  ;;  %v1179_v18 = vmov %v355_v56 }
  0xd2   :  { %v237_v21 = vpop.f32.mrf.mxu1 }
  0xd3   :  { %350 = vst [vmem:[#allocation2 + $0xe0] sm:$0xff] %v197_v20  ;;  %v238_v24 = vadd.f32 %v237_v21, %v1072_v19 }
  0xd4   :  { %v278_v25 = vpop.f32.mrf.mxu2  ;;  %v319_v26 = vpop.f32.mrf.mxu3  ;;  %665 = sbr.rel (%p715_p2) target bundleno = 421 (0x1a5), region = 78 }
  0xd5   :  { %351 = vst [vmem:[#allocation2 + $0xe8] sm:$0xff] %v238_v24  ;;  %v279_v27 = vadd.f32 %v278_v25, %v1075_v22  ;;  %v320_v28 = vadd.f32 %v319_v26, %v1077_v23 }
  0xd7   :  { %352 = vst [vmem:[#allocation2 + $0xf0] sm:$0xff] %v279_v27 }
  0xd8   :  { %353 = vst [vmem:[#allocation2 + $0xf8] sm:$0xff] %v320_v28 }
  0xd9 LB: > { %v432_v19 = vld [vmem:[#allocation12 + $0x1e0] sm:$0xff]  ;;  %v433_v22 = vld [vmem:[#allocation12 + $0x1e8] sm:$0xff]  ;;  %v434_v23 = vld [vmem:[#allocation12 + $0x1f0] sm:$0xff]  ;;  %v584_v24 = vstv %s946_s14  ;;  %s718_s0 = sshll.u32 %s946_s14, 5  ;;  %s360_s14 = sadd.s32 1, %s946_s14   ;;  %s946_s14 = sphi %s1126_s14, %s360_s14   ;;  %v942_v56 = vphi %v355_v56, %v1181_v56   ;;  %v938_v57 = vphi %v356_v57, %v1180_v57  }
  0xda   : > { %436 = vmatpush.msra.mxu0 %v432_v19  ;;  %456 = vmatpush.msra.mxu1 %v433_v22  ;;  %v428_v30 = vld [vmem:[#allocation12 + $0x1c0] sm:$0xff]  ;;  %v429_v31 = vld [vmem:[#allocation12 + $0x1c8] sm:$0xff]  ;;  %v430_v32 = vld [vmem:[#allocation12 + $0x1d0] sm:$0xff]  ;;  %vm585_vm1 = vcmp.gt.s32.totalorder %v1097_v55, %v584_v24  ;;  %v965_v19 = vmov 0   ;;  %s367_s15 = scalar_lea.vmem [#allocation2], %s718_s0  ;;  %p359_p3 = scmp.ge.s32.totalorder %s360_s14, %s1033_s9 }
  0xdb   : > { %476 = vmatpush.msra.mxu2 %v434_v23  ;;  %v424_v33 = vld [vmem:[#allocation12 + $0x1a0] sm:$0xff]  ;;  %v425_v34 = vld [vmem:[#allocation12 + $0x1a8] sm:$0xff]  ;;  %v426_v35 = vld [vmem:[#allocation12 + $0x1b0] sm:$0xff]  ;;  %v586_v22 = vsel %vm585_vm1, 1, %v965_v19  ;;  %770 = vset.pattern.permute.xlu0 %v965_v19 }
  0xdc   : > { %437 = vmatpush.msra.mxu0 %v428_v30  ;;  %457 = vmatpush.msra.mxu1 %v429_v31  ;;  %v420_v36 = vld [vmem:[#allocation12 + $0x180] sm:$0xff]  ;;  %v421_v37 = vld [vmem:[#allocation12 + $0x188] sm:$0xff]  ;;  %v422_v38 = vld [vmem:[#allocation12 + $0x190] sm:$0xff] }
  0xdd   : > { %477 = vmatpush.msra.mxu2 %v430_v32  ;;  %v416_v39 = vld [vmem:[#allocation12 + $0x160] sm:$0xff]  ;;  %v417_v40 = vld [vmem:[#allocation12 + $0x168] sm:$0xff]  ;;  %v418_v41 = vld [vmem:[#allocation12 + $0x170] sm:$0xff]  ;;  %588 = vperm.xlu0 %770, %v586_v22  }
  0xde   : > { %438 = vmatpush.msra.mxu0 %v424_v33  ;;  %458 = vmatpush.msra.mxu1 %v425_v34  ;;  %v412_v42 = vld [vmem:[#allocation12 + $0x140] sm:$0xff]  ;;  %v413_v43 = vld [vmem:[#allocation12 + $0x148] sm:$0xff]  ;;  %v435_v44 = vld [vmem:[#allocation12 + $0x1f8] sm:$0xff] }
  0xdf   : > { %478 = vmatpush.msra.mxu2 %v426_v35  ;;  %v414_v45 = vld [vmem:[#allocation12 + $0x150] sm:$0xff]  ;;  %v431_v46 = vld [vmem:[#allocation12 + $0x1d8] sm:$0xff]  ;;  %v408_v47 = vld [vmem:[#allocation12 + $0x120] sm:$0xff]  ;;  %496 = vmatpush.msra.mxu3 %v435_v44 }
  0xe0   : > { %439 = vmatpush.msra.mxu0 %v420_v36  ;;  %459 = vmatpush.msra.mxu1 %v421_v37  ;;  %v409_v48 = vld [vmem:[#allocation12 + $0x128] sm:$0xff]  ;;  %v410_v49 = vld [vmem:[#allocation12 + $0x130] sm:$0xff]  ;;  %v427_v50 = vld [vmem:[#allocation12 + $0x1b8] sm:$0xff] }
  0xe1   : > { %479 = vmatpush.msra.mxu2 %v422_v38  ;;  %v404_v51 = vld [vmem:[#allocation12 + $0x100] sm:$0xff]  ;;  %v405_v52 = vld [vmem:[#allocation12 + $0x108] sm:$0xff]  ;;  %497 = vmatpush.msra.mxu3 %v431_v46  ;;  %v406_v53 = vld [vmem:[#allocation12 + $0x110] sm:$0xff] }
  0xe2   : > { %440 = vmatpush.msra.mxu0 %v416_v39  ;;  %460 = vmatpush.msra.mxu1 %v417_v40  ;;  %v423_v54 = vld [vmem:[#allocation12 + $0x198] sm:$0xff]  ;;  %v400_v58 = vld [vmem:[#allocation12 + $0xe0] sm:$0xff]  ;;  %v401_v59 = vld [vmem:[#allocation12 + $0xe8] sm:$0xff] }
  0xe3   : > { %480 = vmatpush.msra.mxu2 %v418_v41  ;;  %498 = vmatpush.msra.mxu3 %v427_v50  ;;  %v402_v60 = vld [vmem:[#allocation12 + $0xf0] sm:$0xff]  ;;  %v419_v61 = vld [vmem:[#allocation12 + $0x178] sm:$0xff]  ;;  %v396_v62 = vld [vmem:[#allocation12 + $0xc0] sm:$0xff] }
  0xe4   : > { %441 = vmatpush.msra.mxu0 %v412_v42  ;;  %461 = vmatpush.msra.mxu1 %v413_v43  ;;  %v397_v63 = vld [vmem:[#allocation12 + $0xc8] sm:$0xff]  ;;  %v398_v0 = vld [vmem:[#allocation12 + $0xd0] sm:$0xff]  ;;  %v415_v1 = vld [vmem:[#allocation12 + $0x158] sm:$0xff] }
  0xe5   : > { %481 = vmatpush.msra.mxu2 %v414_v45  ;;  %499 = vmatpush.msra.mxu3 %v423_v54  ;;  %v392_v2 = vld [vmem:[#allocation12 + $0xa0] sm:$0xff]  ;;  %v393_v3 = vld [vmem:[#allocation12 + $0xa8] sm:$0xff]  ;;  %v394_v4 = vld [vmem:[#allocation12 + $0xb0] sm:$0xff] }
  0xe6   : > { %442 = vmatpush.msra.mxu0 %v408_v47  ;;  %462 = vmatpush.msra.mxu1 %v409_v48  ;;  %v411_v5 = vld [vmem:[#allocation12 + $0x138] sm:$0xff]  ;;  %v388_v6 = vld [vmem:[#allocation12 + $0x80] sm:$0xff]  ;;  %v389_v7 = vld [vmem:[#allocation12 + $0x88] sm:$0xff] }
  0xe7   : > { %482 = vmatpush.msra.mxu2 %v410_v49  ;;  %500 = vmatpush.msra.mxu3 %v419_v61  ;;  %v390_v8 = vld [vmem:[#allocation12 + $0x90] sm:$0xff]  ;;  %v407_v9 = vld [vmem:[#allocation12 + $0x118] sm:$0xff]  ;;  %v384_v10 = vld [vmem:[#allocation12 + $0x60] sm:$0xff] }
  0xe8   : > { %443 = vmatpush.msra.mxu0 %v404_v51  ;;  %463 = vmatpush.msra.mxu1 %v405_v52  ;;  %v385_v11 = vld [vmem:[#allocation12 + $0x68] sm:$0xff]  ;;  %v386_v12 = vld [vmem:[#allocation12 + $0x70] sm:$0xff]  ;;  %v403_v13 = vld [vmem:[#allocation12 + $0xf8] sm:$0xff] }
  0xe9   : > { %483 = vmatpush.msra.mxu2 %v406_v53  ;;  %501 = vmatpush.msra.mxu3 %v415_v1  ;;  %v380_v14 = vld [vmem:[#allocation12 + $0x40] sm:$0xff]  ;;  %v381_v15 = vld [vmem:[#allocation12 + $0x48] sm:$0xff]  ;;  %v382_v16 = vld [vmem:[#allocation12 + $0x50] sm:$0xff] }
  0xea   : > { %444 = vmatpush.msra.mxu0 %v400_v58  ;;  %464 = vmatpush.msra.mxu1 %v401_v59  ;;  %v399_v17 = vld [vmem:[#allocation12 + $0xd8] sm:$0xff]  ;;  %v376_v20 = vld [vmem:[#allocation12 + $0x20] sm:$0xff]  ;;  %v377_v21 = vld [vmem:[#allocation12 + $0x28] sm:$0xff] }
  0xeb   : > { %484 = vmatpush.msra.mxu2 %v402_v60  ;;  %502 = vmatpush.msra.mxu3 %v411_v5  ;;  %v378_v25 = vld [vmem:[#allocation12 + $0x30] sm:$0xff]  ;;  %v395_v26 = vld [vmem:[#allocation12 + $0xb8] sm:$0xff]  ;;  %v372_v27 = vld [vmem:[#allocation12] sm:$0xff] }
  0xec   : > { %445 = vmatpush.msra.mxu0 %v396_v62  ;;  %465 = vmatpush.msra.mxu1 %v397_v63  ;;  %v373_v28 = vld [vmem:[#allocation12 + $0x8] sm:$0xff]  ;;  %v374_v29 = vld [vmem:[#allocation12 + $0x10] sm:$0xff]  ;;  %v391_v18 = vld [vmem:[#allocation12 + $0x98] sm:$0xff] }
  0xed   : > { %485 = vmatpush.msra.mxu2 %v398_v0  ;;  %503 = vmatpush.msra.mxu3 %v407_v9  ;;  %v387_v23 = vld [vmem:[#allocation12 + $0x78] sm:$0xff]  ;;  %v368_v33 = vld [vmem:[%s367_s15] sm:$0xff]  ;;  %v370_v41 = vld [vmem:[%s367_s15 + $0x10] sm:$0xff] }
  0xee   : > { %446 = vmatpush.msra.mxu0 %v392_v2  ;;  %466 = vmatpush.msra.mxu1 %v393_v3  ;;  %v383_v30 = vld [vmem:[#allocation12 + $0x58] sm:$0xff]  ;;  %v371_v49 = vld [vmem:[%s367_s15 + $0x18] sm:$0xff] }
  0xef   : > { %486 = vmatpush.msra.mxu2 %v394_v4  ;;  %504 = vmatpush.msra.mxu3 %v403_v13  ;;  %v379_v31 = vld [vmem:[#allocation12 + $0x38] sm:$0xff] }
  0xf0   : > { %447 = vmatpush.msra.mxu0 %v388_v6  ;;  %467 = vmatpush.msra.mxu1 %v389_v7  ;;  %v375_v32 = vld [vmem:[#allocation12 + $0x18] sm:$0xff] }
  0xf1   : > { %487 = vmatpush.msra.mxu2 %v390_v8  ;;  %505 = vmatpush.msra.mxu3 %v399_v17  ;;  %v369_v34 = vld [vmem:[%s367_s15 + $0x8] sm:$0xff] }
  0xf2   : > { %448 = vmatpush.msra.mxu0 %v384_v10  ;;  %468 = vmatpush.msra.mxu1 %v385_v11 }
  0xf3   : > { %488 = vmatpush.msra.mxu2 %v386_v12  ;;  %506 = vmatpush.msra.mxu3 %v395_v26 }
  0xf4   : > { %449 = vmatpush.msra.mxu0 %v380_v14  ;;  %469 = vmatpush.msra.mxu1 %v381_v15 }
  0xf5   : > { %489 = vmatpush.msra.mxu2 %v382_v16  ;;  %507 = vmatpush.msra.mxu3 %v391_v18 }
  0xf6   : > { %450 = vmatpush.msra.mxu0 %v376_v20  ;;  %470 = vmatpush.msra.mxu1 %v377_v21 }
  0xf7   : > { %490 = vmatpush.msra.mxu2 %v378_v25  ;;  %508 = vmatpush.msra.mxu3 %v387_v23 }
  0xf8   : > { %451 = vmatpush.msra.mxu0 %v372_v27  ;;  %471 = vmatpush.msra.mxu1 %v373_v28 }
  0xf9   : > { %491 = vmatpush.msra.mxu2 %v374_v29  ;;  %452 = vmatmul.f32.vlgmr.msra.gmra.mxu0 %v942_v56 }
  0xfa   : > { %472 = vmatmul.f32.vlgmr.msra.gmra.mxu1 %v942_v56  ;;  %492 = vmatmul.f32.vlgmr.msra.gmra.mxu2 %v942_v56 }
  0xfb   : > { %509 = vmatpush.msra.mxu3 %v383_v30 }
  0xfd   : > { %510 = vmatpush.msra.mxu3 %v379_v31 }
  0xff   : > { %511 = vmatpush.msra.mxu3 %v375_v32 }
 0x100   : > { %512 = vmatmul.f32.vlgmr.msra.gmra.mxu3 %v942_v56 }
 0x14f   : > { %v589_v15 = vpop.permute.xlu0 %588 }
 0x150   : > { %vm590_vm10 = vcmp.eq.s32.totalorder %v589_v15, 1 }
 0x176   : > { %v453_v35 = vpop.f32.mrf.mxu0 }
 0x177   : > { %v516_v36 = vadd.f32 %v453_v35, %v368_v33  ;;  %v473_v37 = vpop.f32.mrf.mxu1 }
 0x178   : > { %v517_v38 = vadd.f32 %v473_v37, %v369_v34 }
 0x179   : > { %v711_v39 = vmul.f32 -1.442695, %v516_v36 }
 0x17a   : > { %v712_v40 = vmul.f32 -1.442695, %v517_v38 }
 0x17b   : > { %771 = vpow2.f32 %v711_v39 }
 0x17c   : > { %773 = vpow2.f32 %v712_v40 }
 0x17d   : > { %v493_v42 = vpop.f32.mrf.mxu2 }
 0x17e   : > { %v518_v43 = vadd.f32 %v493_v42, %v370_v41 }
 0x180   : > { %v713_v44 = vmul.f32 -1.442695, %v518_v43 }
 0x181   : > { %v772_v45 = vpop.eup %771 }
 0x182   : > { %v774_v46 = vpop.eup %773  ;;  %v529_v47 = vadd.f32 1.0, %v772_v45  ;;  %775 = vpow2.f32 %v713_v44 }
 0x183   : > { %v530_v48 = vadd.f32 1.0, %v774_v46  ;;  %v513_v50 = vpop.f32.mrf.mxu3 }
 0x184   : > { %777 = vrcp.f32 %v529_v47  ;;  %v519_v52 = vadd.f32 %v513_v50, %v371_v49  ;;  %v543_v63 = vand.u32 2147483648, %v529_v47  ;;  %v541_v1 = vand.u32 2147483647, %v529_v47 }
 0x185   : > { %779 = vrcp.f32 %v530_v48  ;;  %v558_v2 = vand.u32 2147483648, %v530_v48  ;;  %v556_v4 = vand.u32 2147483647, %v530_v48  ;;  %vm537_vm4 = vweird.f32 %v529_v47 }
 0x186   : > { %v544_v9 = vor.u32 1.1754944e-38, %v543_v63  ;;  %vm552_vm6 = vweird.f32 %v530_v48  ;;  %vm542_vm7 = vcmp.eq.f32.partialorder %v541_v1, 8.507059e+37 }
 0x187   : > { %v559_v12 = vor.u32 1.1754944e-38, %v558_v2  ;;  %vm557_vm9 = vcmp.eq.f32.partialorder %v556_v4, 8.507059e+37 }
 0x188   : > { %v776_v51 = vpop.eup %775 }
 0x189   : > { %v531_v53 = vadd.f32 1.0, %v776_v51 }
 0x18a   : > { %v778_v54 = vpop.eup %777 }
 0x18b   : > { %v780_v58 = vpop.eup %779  ;;  %v533_v59 = vmul.f32 %v778_v54, %v529_v47  ;;  %781 = vrcp.f32 %v531_v53  ;;  %vm538_vm2 = vweird.f32 %v778_v54  ;;  %v573_v27 = vand.u32 2147483648, %v531_v53 }
 0x18c   : > { %v548_v60 = vmul.f32 %v780_v58, %v530_v48  ;;  %783 = vtanh.f32 %v519_v52  ;;  %vm553_vm3 = vweird.f32 %v780_v58  ;;  %vm539_vm5 = vmor %vm537_vm4, %vm538_vm2  ;;  %vm567_vm12 = vweird.f32 %v531_v53 }
 0x18d   : > { %v534_v61 = vsub.f32 1.0, %v533_v59  ;;  %vm554_vm8 = vmor %vm552_vm6, %vm553_vm3  ;;  %v571_v29 = vand.u32 2147483647, %v531_v53  ;;  %v574_v19 = vor.u32 1.1754944e-38, %v573_v27 }
 0x18e   : > { %v549_v62 = vsub.f32 1.0, %v548_v60 }
 0x18f   : > { %v535_v0 = vmul.f32 %v778_v54, %v534_v61  ;;  %vm572_vm14 = vcmp.eq.f32.partialorder %v571_v29, 8.507059e+37 }
 0x190   : > { %v550_v3 = vmul.f32 %v780_v58, %v549_v62 }
 0x191   : > { %v782_v5 = vpop.eup %781  ;;  %v536_v6 = vadd.f32 %v778_v54, %v535_v0 }
 0x192   : > { %v784_v7 = vpop.eup %783  ;;  %v563_v8 = vmul.f32 %v782_v5, %v531_v53  ;;  %v551_v10 = vadd.f32 %v780_v58, %v550_v3  ;;  %vm568_vm11 = vweird.f32 %v782_v5 }
 0x193   : > { %v540_v11 = vsel %vm539_vm5, %v778_v54, %v536_v6  ;;  %vm569_vm13 = vmor %vm567_vm12, %vm568_vm11 }
 0x194   : > { %v564_v13 = vsub.f32 1.0, %v563_v8  ;;  %v545_v14 = vsel %vm542_vm7, %v544_v9, %v540_v11  ;;  %v555_v16 = vsel %vm554_vm8, %v780_v58, %v551_v10 }
 0x195   : > { %v579_v17 = vmul.f32 %v784_v7, %v545_v14  ;;  %v560_v20 = vsel %vm557_vm9, %v559_v12, %v555_v16 }
 0x196   : > { %v565_v21 = vmul.f32 %v782_v5, %v564_v13  ;;  %v578_v24 = vmul.f32 %v938_v57, %v560_v20 }
 0x198   : > { %v580_v25 = vadd.f32 %v579_v17, %v578_v24  ;;  %v566_v26 = vadd.f32 %v782_v5, %v565_v21 }
 0x19a   : > { %785 = vtanh.f32 %v580_v25  ;;  %v592_v28 = vsel %vm590_vm10, %v580_v25, %v938_v57   ;;  %v570_v18 = vsel %vm569_vm13, %v782_v5, %v566_v26 }
 0x19b   : > { %v575_v23 = vsel %vm572_vm14, %v574_v19, %v570_v18  ;;  %v1180_v57 = vmov %v592_v28  ;;  %v1182_v29 = vmov (%p359_p3), %v592_v28 }
 0x1a0   : > { %v786_v22 = vpop.eup %785  ;;  %362 = sbr.rel (!%p359_p3) target bundleno = 217 (0xd9), region = 84 }
 0x1a1   : > { %v582_v30 = vmul.f32 %v786_v22, %v575_v23 }
 0x1a3   : > { %v591_v31 = vsel %vm590_vm10, %v582_v30, %v942_v56  }
 0x1a4   : > { %v1181_v56 = vmov %v591_v31  ;;  %v1183_v18 = vmov (%p359_p3), %v591_v31 }
 0x1a5 PF:  { %593 = vst [vmem:[#allocation3] sm:$0xff] %v954_v18  ;;  %v954_v18 = vphi %v1179_v18, %v1183_v18   ;;  %v950_v29 = vphi %v1178_v29, %v1182_v29  }
 0x1a6   :  { %594 = vst [vmem:[#allocation4] sm:$0xff] %v950_v29 }
 0x1a7 PF:  { %v614_v56 = vld [vmem:[#allocation13 + $0x78] sm:$0xff]  ;;  %v613_v32 = vld [vmem:[#allocation13 + $0x70] sm:$0xff]  ;;  %v612_v33 = vld [vmem:[#allocation13 + $0x68] sm:$0xff]  ;;  %s966_s18 = smov [#allocation15]   ;;  %s647_s21 = sshll.u32 %s1177_s8, 4  ;;  %s648_s21 = int_to_ptr.hbm [resolvable:$true] %s647_s21 }
 0x1a8   :  { %619 = vmatpush.msra.mxu0 %v614_v56  ;;  %v611_v34 = vld [vmem:[#allocation13 + $0x60] sm:$0xff]  ;;  %v610_v55 = vld [vmem:[#allocation13 + $0x58] sm:$0xff]  ;;  %v609_v57 = vld [vmem:[#allocation13 + $0x50] sm:$0xff]  ;;  %s645_s3 = sshll.u32 %s966_s18, 4  ;;  %s646_s3 = int_to_ptr.vmem [resolvable:$true] %s645_s3 }
 0x1a9   :  { %v608_v35 = vld [vmem:[#allocation13 + $0x48] sm:$0xff]  ;;  %v607_v36 = vld [vmem:[#allocation13 + $0x40] sm:$0xff]  ;;  %v606_v37 = vld [vmem:[#allocation13 + $0x38] sm:$0xff] }
 0x1aa   :  { %620 = vmatpush.msra.mxu0 %v613_v32  ;;  %v605_v38 = vld [vmem:[#allocation13 + $0x30] sm:$0xff]  ;;  %v604_v39 = vld [vmem:[#allocation13 + $0x28] sm:$0xff]  ;;  %v603_v40 = vld [vmem:[#allocation13 + $0x20] sm:$0xff] }
 0x1ab   :  { %v602_v41 = vld [vmem:[#allocation13 + $0x18] sm:$0xff]  ;;  %v601_v42 = vld [vmem:[#allocation13 + $0x10] sm:$0xff]  ;;  %v600_v43 = vld [vmem:[#allocation13 + $0x8] sm:$0xff] }
 0x1ac   :  { %621 = vmatpush.msra.mxu0 %v612_v33  ;;  %v599_v44 = vld [vmem:[#allocation13] sm:$0xff]  ;;  %v598_v45 = vld [vmem:[#allocation3] sm:$0xff] }
 0x1ad   :  { %v787_v46 = vld [vmem:[%s1176_s7] ss:$0 sm:$0xff] }
 0x1ae   :  { %622 = vmatpush.msra.mxu0 %v611_v34 }
 0x1b0   :  { %623 = vmatpush.msra.mxu0 %v610_v55 }
 0x1b2   :  { %624 = vmatpush.msra.mxu0 %v609_v57 }
 0x1b4   :  { %625 = vmatpush.msra.mxu0 %v608_v35 }
 0x1b6   :  { %626 = vmatpush.msra.mxu0 %v607_v36 }
 0x1b8   :  { %627 = vmatpush.msra.mxu0 %v606_v37 }
 0x1ba   :  { %628 = vmatpush.msra.mxu0 %v605_v38 }
 0x1bc   :  { %629 = vmatpush.msra.mxu0 %v604_v39 }
 0x1be   :  { %630 = vmatpush.msra.mxu0 %v603_v40 }
 0x1c0   :  { %631 = vmatpush.msra.mxu0 %v602_v41 }
 0x1c2   :  { %632 = vmatpush.msra.mxu0 %v601_v42 }
 0x1c4   :  { %633 = vmatpush.msra.mxu0 %v600_v43 }
 0x1c6   :  { %634 = vmatpush.msra.mxu0 %v599_v44 }
 0x1c7   :  { %635 = vmatmul.f32.vlgmr.msra.gmra.mxu0 %v598_v45 }
 0x244   :  { %v636_v47 = vpop.f32.mrf.mxu0 }
 0x245   :  { %v637_v48 = vadd.f32 %v787_v46, %v636_v47 }
 0x247   :  { %639 = vst [vmem:[#allocation15] sm:$0xff] %v637_v48 }
 0x248   :  { %650 = dma.vmem_to_hbm [thread:$0]  %s646_s3, 128, %s648_s21, [#allocation9]  }
 0x249   :  { %934 = dma.done.wait [#allocation9], 128  }
 0x24a   :  { %935 = vsyncadd [#allocation9], 4294967168 }
 0x24b   :  { %655 = vsyncpa [#allocation8], 1 }
 0x24c   :  { %656 = vsyncpa [#allocation11], 1 }
 0x24d   :  { %657 = vsyncpa [#allocation14], 1 }
 0x24e   :  { %658 = vsyncpa [#allocation9], 1 }

</bundles_post_ra>
